<compile_context>
chip_gen: v5e
topology: v5e:2x2
jax: 0.10.0
libtpu: 0.0.40
codegen_flags: <defaults>
</compile_context>

<pallas_src>
import math
import functools

import jax
import jax.numpy as jnp
from jax.experimental import pallas as pl
from jax.experimental.pallas import tpu as pltpu


def _round_up(n, m):
    return ((n + m - 1) // m) * m


def rnn_cell_kernel(xT_ref, hT_ref, wi_ref, wh_ref, wo_ref, bih_ref, bo_ref,
                    yT_ref, h1T_ref):
    xT = xT_ref[...].astype(jnp.float32)      # (1, tb)   batch on lanes
    hT = hT_ref[...]                          # (nh, tb)
    wi = wi_ref[...].astype(jnp.float32)      # (nh, 1)   w_i column
    wh = wh_ref[...]                          # (nh, nh)
    wo = wo_ref[...].astype(jnp.float32)      # (1, nh)
    bih = bih_ref[...].astype(jnp.float32)    # (nh, 1)   b_i + b_h column
    bo = bo_ref[0]                            # scalar (SMEM)

    # h1T = w_h @ hT (MXU, lane-dense) + w_i ⊗ x (VPU broadcast mul) + bias.
    h1T = (jnp.dot(wh, hT, preferred_element_type=jnp.float32)
           + wi * xT
           + bih)                             # (nh, tb) f32

    # yT = w_o @ h1T : result is a dense (1, tb) lane row — no masked stores.
    yT = jnp.dot(wo, h1T, preferred_element_type=jnp.float32) + bo

    h1T_ref[...] = h1T.astype(h1T_ref.dtype)
    yT_ref[...] = yT.astype(yT_ref.dtype)


def rnn_cell_forward(x, h, w_i, w_h, w_o, b_i, b_h, b_o, *, block_b=4096):
    """Pallas wrapper. x:(B,1), h:(B,nh). Returns (y1:(B,1), h1:(B,nh))."""
    B = x.shape[0]
    nh = h.shape[1]
    out_dtype = jnp.promote_types(x.dtype, h.dtype)

    # Feature-major / batch-minor layout: batch on the 128-lane axis.
    xT = x.T                                   # (1, B)
    hT = h.T                                   # (nh, B)

    # Loop-invariant weight/bias layout plumbing, done once in the wrapper.
    wi_col = w_i.reshape(nh, 1)                # (nh, 1)
    wo_row = w_o.reshape(1, nh)                # (1, nh)
    bih_col = (b_i + b_h).reshape(nh, 1).astype(jnp.float32)
    bo_s = b_o.reshape(1).astype(jnp.float32)  # SMEM scalar

    # Batch tile on the lane axis: multiple of 128, capped at block_b.
    tb = max(128, min(_round_up(block_b, 128), _round_up(B, 128)))
    b_pad = _round_up(B, tb)
    if b_pad != B:
        xT = jnp.pad(xT, ((0, 0), (0, b_pad - B)))
        hT = jnp.pad(hT, ((0, 0), (0, b_pad - B)))
    num_tiles = b_pad // tb

    yT, h1T = pl.pallas_call(
        rnn_cell_kernel,
        out_shape=(
            jax.ShapeDtypeStruct((1, b_pad), out_dtype),
            jax.ShapeDtypeStruct((nh, b_pad), out_dtype),
        ),
        grid=(num_tiles,),
        in_specs=[
            pl.BlockSpec((1, tb), lambda i: (0, i)),      # xT
            pl.BlockSpec((nh, tb), lambda i: (0, i)),     # hT
            pl.BlockSpec((nh, 1), lambda i: (0, 0)),      # w_i col  (resident)
            pl.BlockSpec((nh, nh), lambda i: (0, 0)),     # w_h      (resident)
            pl.BlockSpec((1, nh), lambda i: (0, 0)),      # w_o row  (resident)
            pl.BlockSpec((nh, 1), lambda i: (0, 0)),      # b_i+b_h  (resident)
            pl.BlockSpec(memory_space=pltpu.MemorySpace.SMEM),  # b_o scalar
        ],
        out_specs=(
            pl.BlockSpec((1, tb), lambda i: (0, i)),      # yT  (lane-dense)
            pl.BlockSpec((nh, tb), lambda i: (0, i)),     # h1T (lane-dense)
        ),
        compiler_params=pltpu.CompilerParams(
            dimension_semantics=("parallel",)),
    )(xT, hT, wi_col, w_h, wo_row, bih_col, bo_s)

    # Back to the module's batch-major layout; drop padded tail columns.
    y1 = yT[:, :B].T
    h1 = h1T[:, :B].T
    return y1, h1


def init_params(key, nh, dtype=jnp.float32):
    """Mirror of reset_parameters(): uniform(-std, std), std = 1/sqrt(nh)."""
    std = 1.0 / math.sqrt(nh)
    ks = jax.random.split(key, 6)
    w_i = jax.random.uniform(ks[0], (nh, 1), dtype, -std, std)
    w_h = jax.random.uniform(ks[1], (nh, nh), dtype, -std, std)
    w_o = jax.random.uniform(ks[2], (1, nh), dtype, -std, std)
    b_i = jax.random.uniform(ks[3], (nh,), dtype, -std, std)
    b_h = jax.random.uniform(ks[4], (nh,), dtype, -std, std)
    b_o = jax.random.uniform(ks[5], (1,), dtype, -std, std)
    return w_i, w_h, w_o, b_i, b_h, b_o


def reference_forward(x, h, w_i, w_h, w_o, b_i, b_h, b_o):
    h1 = (x @ w_i.T + b_i) + (h @ w_h.T + b_h)
    y1 = h1 @ w_o.T + b_o
    return y1, h1


if __name__ == "__main__":
    key = jax.random.PRNGKey(0)
    k_param, k_x, k_h = jax.random.split(key, 3)

    B, nh = 8, 32
    w_i, w_h, w_o, b_i, b_h, b_o = init_params(k_param, nh)
    x = jax.random.normal(k_x, (B, 1), jnp.float32)
    h = jax.random.normal(k_h, (B, nh), jnp.float32)

    fwd = jax.jit(functools.partial(rnn_cell_forward, block_b=4096))
    y1, h1 = fwd(x, h, w_i, w_h, w_o, b_i, b_h, b_o)
    jax.block_until_ready((y1, h1))

    y1_ref, h1_ref = reference_forward(x, h, w_i, w_h, w_o, b_i, b_h, b_o)
    assert y1.shape == (B, 1) and h1.shape == (B, nh)
    assert jnp.allclose(y1, y1_ref, atol=1e-5, rtol=1e-5)
    assert jnp.allclose(h1, h1_ref, atol=1e-5, rtol=1e-5)

    print("KERNEL_OK")
</pallas_src>

<mosaic_0001>
module attributes {stable_mosaic.version = 11 : i64} {
  func.func @rnn_cell_kernel(%arg0: i32, %arg1: memref<1x128xf32, #tpu.memory_space<vmem>>, %arg2: memref<32x128xf32, #tpu.memory_space<vmem>>, %arg3: memref<32x1xf32, #tpu.memory_space<vmem>>, %arg4: memref<32x32xf32, #tpu.memory_space<vmem>>, %arg5: memref<1x32xf32, #tpu.memory_space<vmem>>, %arg6: memref<32x1xf32, #tpu.memory_space<vmem>>, %arg7: memref<1xf32, #tpu.memory_space<smem>>, %arg8: memref<1x128xf32, #tpu.memory_space<vmem>>, %arg9: memref<32x128xf32, #tpu.memory_space<vmem>>) attributes {dimension_semantics = [#tpu.dimension_semantics<parallel>], iteration_bounds = array<i64: 1>, scalar_prefetch = 0 : i64, scratch_operands = 0 : i64, tpu.core_type = #tpu.core_type<tc>, window_params = [{transform_indices = @transform_0, window_bounds = array<i64: 1, 128>}, {transform_indices = @transform_1, window_bounds = array<i64: 32, 128>}, {pipeline_mode = #tpu.pipeline_mode<synchronous>, transform_indices = @transform_2, window_bounds = array<i64: 32, 1>}, {pipeline_mode = #tpu.pipeline_mode<synchronous>, transform_indices = @transform_3, window_bounds = array<i64: 32, 32>}, {pipeline_mode = #tpu.pipeline_mode<synchronous>, transform_indices = @transform_4, window_bounds = array<i64: 1, 32>}, {pipeline_mode = #tpu.pipeline_mode<synchronous>, transform_indices = @transform_5, window_bounds = array<i64: 32, 1>}, {transform_indices = @transform_6, window_bounds = array<i64: 1>}, {transform_indices = @transform_7, window_bounds = array<i64: 1, 128>}, {transform_indices = @transform_8, window_bounds = array<i64: 32, 128>}]} {
    %c0 = arith.constant 0 : index
    %c0_0 = arith.constant 0 : index
    %0 = vector.load %arg1[%c0, %c0_0] : memref<1x128xf32, #tpu.memory_space<vmem>>, vector<1x128xf32>
    %c0_1 = arith.constant 0 : index
    %c0_2 = arith.constant 0 : index
    %1 = vector.load %arg2[%c0_1, %c0_2] : memref<32x128xf32, #tpu.memory_space<vmem>>, vector<32x128xf32>
    %c0_3 = arith.constant 0 : index
    %c0_4 = arith.constant 0 : index
    %2 = vector.load %arg3[%c0_3, %c0_4] : memref<32x1xf32, #tpu.memory_space<vmem>>, vector<32x1xf32>
    %c0_5 = arith.constant 0 : index
    %c0_6 = arith.constant 0 : index
    %3 = vector.load %arg4[%c0_5, %c0_6] : memref<32x32xf32, #tpu.memory_space<vmem>>, vector<32x32xf32>
    %c0_7 = arith.constant 0 : index
    %c0_8 = arith.constant 0 : index
    %4 = vector.load %arg5[%c0_7, %c0_8] : memref<1x32xf32, #tpu.memory_space<vmem>>, vector<1x32xf32>
    %c0_9 = arith.constant 0 : index
    %c0_10 = arith.constant 0 : index
    %5 = vector.load %arg6[%c0_9, %c0_10] : memref<32x1xf32, #tpu.memory_space<vmem>>, vector<32x1xf32>
    %c0_11 = arith.constant 0 : index
    %6 = memref.load %arg7[%c0_11] : memref<1xf32, #tpu.memory_space<smem>>
    %cst = arith.constant dense<0.000000e+00> : vector<32x128xf32>
    %7 = tpu.matmul %3, %1, %cst {dimension_numbers = #tpu.dot_dimension_numbers<[1], [0], [0], [1], [0, 0, 1, 1], [], []>} : vector<32x32xf32>, vector<32x128xf32>, vector<32x128xf32> -> vector<32x128xf32>
    %8 = vector.broadcast %2 : vector<32x1xf32> to vector<32x128xf32>
    %9 = vector.broadcast %0 : vector<1x128xf32> to vector<32x128xf32>
    %10 = arith.mulf %8, %9 : vector<32x128xf32>
    %11 = arith.addf %7, %10 : vector<32x128xf32>
    %12 = vector.broadcast %5 : vector<32x1xf32> to vector<32x128xf32>
    %13 = arith.addf %11, %12 : vector<32x128xf32>
    %cst_12 = arith.constant dense<0.000000e+00> : vector<1x128xf32>
    %14 = tpu.matmul %4, %13, %cst_12 {dimension_numbers = #tpu.dot_dimension_numbers<[1], [0], [0], [1], [0, 0, 1, 1], [], []>} : vector<1x32xf32>, vector<32x128xf32>, vector<1x128xf32> -> vector<1x128xf32>
    %15 = vector.broadcast %6 : f32 to vector<1x128xf32>
    %16 = arith.addf %14, %15 : vector<1x128xf32>
    %c0_13 = arith.constant 0 : index
    %c0_14 = arith.constant 0 : index
    %17 = vector.load %arg9[%c0_13, %c0_14] : memref<32x128xf32, #tpu.memory_space<vmem>>, vector<32x128xf32>
    tpu.vector_store %arg9[%c0_13, %c0_14], %13 {strides = array<i32>} : memref<32x128xf32, #tpu.memory_space<vmem>>, vector<32x128xf32>,
    %c0_15 = arith.constant 0 : index
    %c0_16 = arith.constant 0 : index
    %18 = vector.load %arg8[%c0_15, %c0_16] : memref<1x128xf32, #tpu.memory_space<vmem>>, vector<1x128xf32>
    tpu.vector_store %arg8[%c0_15, %c0_16], %16 {strides = array<i32>} : memref<1x128xf32, #tpu.memory_space<vmem>>, vector<1x128xf32>,
    return
  }
  func.func @transform_0(%arg0: i32) -> (i32, i32) {
    %c0_i32 = arith.constant 0 : i32
    %c0_i32_0 = arith.constant 0 : i32
    return %c0_i32, %arg0 : i32, i32
  }
  func.func @transform_1(%arg0: i32) -> (i32, i32) {
    %c0_i32 = arith.constant 0 : i32
    %c0_i32_0 = arith.constant 0 : i32
    return %c0_i32, %arg0 : i32, i32
  }
  func.func @transform_2(%arg0: i32) -> (i32, i32) {
    %c0_i32 = arith.constant 0 : i32
    %c0_i32_0 = arith.constant 0 : i32
    %c0_i32_1 = arith.constant 0 : i32
    return %c0_i32, %c0_i32_0 : i32, i32
  }
  func.func @transform_3(%arg0: i32) -> (i32, i32) {
    %c0_i32 = arith.constant 0 : i32
    %c0_i32_0 = arith.constant 0 : i32
    %c0_i32_1 = arith.constant 0 : i32
    return %c0_i32, %c0_i32_0 : i32, i32
  }
  func.func @transform_4(%arg0: i32) -> (i32, i32) {
    %c0_i32 = arith.constant 0 : i32
    %c0_i32_0 = arith.constant 0 : i32
    %c0_i32_1 = arith.constant 0 : i32
    return %c0_i32, %c0_i32_0 : i32, i32
  }
  func.func @transform_5(%arg0: i32) -> (i32, i32) {
    %c0_i32 = arith.constant 0 : i32
    %c0_i32_0 = arith.constant 0 : i32
    %c0_i32_1 = arith.constant 0 : i32
    return %c0_i32, %c0_i32_0 : i32, i32
  }
  func.func @transform_6(%arg0: i32) -> i32 {
    %c0_i32 = arith.constant 0 : i32
    %c0_i32_0 = arith.constant 0 : i32
    return %c0_i32 : i32
  }
  func.func @transform_7(%arg0: i32) -> (i32, i32) {
    %c0_i32 = arith.constant 0 : i32
    %c0_i32_0 = arith.constant 0 : i32
    return %c0_i32, %arg0 : i32, i32
  }
  func.func @transform_8(%arg0: i32) -> (i32, i32) {
    %c0_i32 = arith.constant 0 : i32
    %c0_i32_0 = arith.constant 0 : i32
    return %c0_i32, %arg0 : i32, i32
  }
}

</mosaic_0001>

<bundles_post_ra>
// kernel: rnn_cell_forward.1
= control target key start
LH: loop header
LB: loop body
LE: loop exit
PB: predicated region body
PF: predicated region fallthrough
CT: control target
= control target key end

     0   :  { %v196_v2 = vmov 0   ;;  %vm75_vm0 = vcmask 261120   ;;  %s319_s1 = inlined_call_operand.vmem [shape: f32[32,128], index: 1, kind: input, shape index: {}]   ;;  %s320_s2 = inlined_call_operand.vmem [shape: f32[32,1], index: 2, kind: input, shape index: {}]   ;;  %s321_s3 = inlined_call_operand.vmem [shape: f32[32,32], index: 3, kind: input, shape index: {}]   ;;  %s322_s0 = inlined_call_operand.vmem [shape: f32[1,128], index: 0, kind: input, shape index: {}]   ;;  %s323_s5 = inlined_call_operand.vmem [shape: f32[32,1], index: 5, kind: input, shape index: {}]   ;;  %s324_s8 = inlined_call_operand.vmem [shape: f32[32,128], index: 8, kind: output, shape index: {1}]   ;;  %s325_s4 = inlined_call_operand.vmem [shape: f32[1,32], index: 4, kind: input, shape index: {}]   ;;  %s326_s6 = inlined_call_operand.<no memory space> [shape: f32[1], index: 6, kind: input, shape index: {}]   ;;  %s327_s7 = inlined_call_operand.vmem [shape: f32[1,128], index: 7, kind: output, shape index: {0}]  }
   0x1   :  { %v33_v0 = vld [vmem:[%s319_s1 + $0x18] sm:$0xff]  ;;  %v32_v1 = vld [vmem:[%s319_s1 + $0x10] sm:$0xff]  ;;  %192 = vset.pattern.permute.xlu0 %v196_v2  ;;  %193 = vset.pattern.permute.xlu1 %v196_v2  ;;  %v31_v4 = vld [vmem:[%s319_s1 + $0x8] sm:$0xff]  ;;  %v141_v43 = vstv %s326_s6 }
   0x2   :  { %183 = vmatpush.msra.mxu2 %v33_v0  ;;  %184 = vmatpush.msra.mxu3 %v33_v0  ;;  %v37_v3 = vld [vmem:[%s320_s2 + $0x18] sm:$0xff]  ;;  %v35_v5 = vld [vmem:[%s320_s2 + $0x8] sm:$0xff]  ;;  %v30_v6 = vld [vmem:[%s319_s1] sm:$0xff] }
   0x3   :  { %100 = vmatpush.msra.mxu0 %v33_v0  ;;  %65 = vperm.xlu0 %192, %v37_v3   ;;  %v39_v7 = vld [vmem:[%s321_s3 + $0x8] sm:$0xff]  ;;  %v40_v8 = vld [vmem:[%s321_s3 + $0x10] sm:$0xff]  ;;  %v34_v9 = vld [vmem:[%s320_s2] sm:$0xff] }
   0x4   :  { %185 = vmatpush.msra.mxu2 %v32_v1  ;;  %186 = vmatpush.msra.mxu3 %v32_v1  ;;  %v38_v10 = vld [vmem:[%s321_s3] sm:$0xff]  ;;  %v36_v11 = vld [vmem:[%s320_s2 + $0x10] sm:$0xff]  ;;  %v46_v12 = vld [vmem:[%s323_s5 + $0x18] sm:$0xff] }
   0x5   :  { %101 = vmatpush.msra.mxu0 %v32_v1  ;;  %55 = vperm.xlu1 %193, %v35_v5   ;;  %v41_v13 = vld [vmem:[%s321_s3 + $0x18] sm:$0xff]  ;;  %v45_v14 = vld [vmem:[%s323_s5 + $0x10] sm:$0xff]  ;;  %v44_v15 = vld [vmem:[%s323_s5 + $0x8] sm:$0xff] }
   0x6   :  { %187 = vmatpush.msra.mxu2 %v31_v4  ;;  %188 = vmatpush.msra.mxu3 %v31_v4  ;;  %v43_v16 = vld [vmem:[%s323_s5] sm:$0xff] }
   0x7   :  { %102 = vmatpush.msra.mxu0 %v31_v4  ;;  %194 = vset.pattern.permute.xlu2 %v196_v2  ;;  %v195_v20 = vld [vmem:[%s322_s0] ss:$0 sm:$0xff] }
   0x8   :  { %189 = vmatpush.msra.mxu2 %v30_v6  ;;  %190 = vmatpush.msra.mxu3 %v30_v6  ;;  %v42_v42 = vld [vmem:[%s325_s4] sm:$0x1] }
   0x9   :  { %179 = vmatmul.msk.f32.vlgmr.msra.gmra.mxu2 %vm75_vm0, %v39_v7  ;;  %180 = vmatmul.msk.f32.vlgmr.msra.gmra.mxu3 %vm75_vm0, %v40_v8 }
   0xa   :  { %103 = vmatpush.msra.mxu0 %v30_v6  ;;  %50 = vperm.xlu2 %194, %v34_v9  }
   0xb   :  { %178 = vmatmul.msk.f32.vlgmr.msra.gmra.mxu0 %vm75_vm0, %v38_v10  ;;  %60 = vperm.xlu0 %192, %v36_v11  }
   0xd   :  { %134 = vperm.xlu1 %193, %v46_v12  }
  0x11   :  { %181 = vmatmul.msk.f32.gmra.mxu3 %vm75_vm0, %v41_v13 }
  0x12   :  { %129 = vperm.xlu2 %194, %v45_v14  }
  0x13   :  { %124 = vperm.xlu0 %192, %v44_v15  }
  0x15   :  { %119 = vperm.xlu1 %193, %v43_v16  }
  0x64   :  { %v51_v21 = vpop.permute.xlu2 %50 }
  0x65   :  { %v71_v23 = vmul.f32 %v195_v20, %v51_v21 }
  0x6c   :  { %v130_v30 = vpop.permute.xlu2 %129 }
  0x75   :  { %v66_v18 = vpop.permute.xlu0 %65 }
  0x76   :  { %v74_v38 = vmul.f32 %v195_v20, %v66_v18 }
  0x77   :  { %v56_v17 = vpop.permute.xlu1 %55 }
  0x78   :  { %v72_v26 = vmul.f32 %v195_v20, %v56_v17 }
  0x7d   :  { %v61_v22 = vpop.permute.xlu0 %60 }
  0x7e   :  { %v73_v27 = vmul.f32 %v195_v20, %v61_v22 }
  0x7f   :  { %v135_v19 = vpop.permute.xlu1 %134 }
  0x85   :  { %v125_v35 = vpop.permute.xlu0 %124 }
  0x87   :  { %v120_v25 = vpop.permute.xlu1 %119 }
  0x88   :  { %v105_v24 = vpop.f32.mrf.mxu0 }
  0x89   :  { %v106_v28 = vadd.f32 %v105_v24, %v71_v23 }
  0x8b   :  { %v137_v29 = vadd.f32 %v120_v25, %v106_v28 }
  0x8c   :  { %v108_v31 = vpop.f32.mrf.mxu2  ;;  %v111_v32 = vpop.f32.mrf.mxu3 }
  0x8d   :  { %165 = vst [vmem:[%s324_s8] sm:$0xff] %v137_v29  ;;  %v109_v33 = vadd.f32 %v108_v31, %v72_v26  ;;  %v112_v34 = vadd.f32 %v111_v32, %v73_v27 }
  0x8f   :  { %v139_v36 = vadd.f32 %v130_v30, %v112_v34  ;;  %v138_v37 = vadd.f32 %v125_v35, %v109_v33 }
  0x91   :  { %167 = vst [vmem:[%s324_s8 + $0x10] sm:$0xff] %v139_v36 }
  0x92   :  { %166 = vst [vmem:[%s324_s8 + $0x8] sm:$0xff] %v138_v37 }
  0x94   :  { %v114_v39 = vpop.f32.mrf.mxu3 }
  0x95   :  { %v115_v40 = vadd.f32 %v114_v39, %v74_v38 }
  0x97   :  { %v140_v41 = vadd.f32 %v135_v19, %v115_v40 }
  0x99   :  { %157 = vmatpush.msra.mxu1 %v140_v41  ;;  %168 = vst [vmem:[%s324_s8 + $0x18] sm:$0xff] %v140_v41 }
  0x9b   :  { %158 = vmatpush.msra.mxu1 %v139_v36 }
  0x9d   :  { %159 = vmatpush.msra.mxu1 %v138_v37 }
  0x9f   :  { %160 = vmatpush.msra.mxu1 %v137_v29 }
  0xa0   :  { %182 = vmatmul.msk.f32.vlgmr.msra.gmra.mxu1 %vm75_vm0, %v42_v42 }
 0x11d   :  { %v162_v44 = vpop.f32.mrf.mxu1 }
 0x11e   :  { %v163_v45 = vadd.f32 %v162_v44, %v141_v43 }
 0x120   :  { %169 = vst [vmem:[%s327_s7] sm:$0x1] %v163_v45 }

</bundles_post_ra>
